<compile_context>
chip_gen: v6e
topology: v6e:2x2x1
jax: 0.10.0
libtpu: 0.0.40
codegen_flags: <defaults>
</compile_context>

<pallas_src>
import jax
import jax.numpy as jnp
from jax.experimental import pallas as pl
from jax.experimental.pallas import tpu as pltpu

_LANES = 128
_BLOCK_BYTES = 4 << 20  # ~4 MiB per block


def _mish_kernel(x_ref, o_ref):
    x = x_ref[...].astype(jnp.float32)
    # tanh(softplus(x)) rewritten with a single transcendental:
    #   e   = exp(-|x|)                       (e <= 1, no overflow)
    #   den = (1 + e)^2
    #   num = e^2 if x >= 0 else 1            (num/den == exp(-2*softplus(x)))
    #   tanh(softplus(x)) = (den - num) / (den + num)
    e = jnp.exp(-jnp.abs(x))
    den = (1.0 + e) * (1.0 + e)
    num = jnp.where(x >= 0.0, e * e, 1.0)
    t = den - num
    s = den + num
    if o_ref.dtype == jnp.float32:
        # Exact divide: keeps error well under 1e-5 (compute hidden under HBM
        # for f32 streams).
        y = x * t / s
    else:
        # 16-bit output: approx EUP reciprocal (error ~2^-14 << bf16 precision)
        # frees VALU slots, which bind on v7x with halved HBM bytes.
        y = x * t * pl.reciprocal(s, approx=True)
    o_ref[...] = y.astype(o_ref.dtype)


def _mish_jnp(x):
    """Stable plain-jnp Mish (used for the <=127-element unaligned tail)."""
    x32 = x.astype(jnp.float32)
    sp = jnp.log1p(jnp.exp(-jnp.abs(x32))) + jnp.maximum(x32, 0.0)
    return (x32 * jnp.tanh(sp)).astype(x.dtype)


def _choose_tile_rows(rows, dtype):
    """Pick sublane tile size: ~4 MiB blocks, >=4 even-count blocks if possible."""
    itemsize = jnp.dtype(dtype).itemsize
    gran = 16 if itemsize == 2 else 8                # packed sublanes for 16-bit
    max_tr = _BLOCK_BYTES // (_LANES * itemsize)
    max_tr = max(gran, (max_tr // gran) * gran)

    # Minimum number of blocks dictated by the block-byte budget.
    min_blocks = -(-rows // max_tr)
    # Prefer >= 4 blocks (2 per v7x TensorCore) with an even count.
    n_blocks = max(min_blocks, 4)
    if n_blocks % 2:
        n_blocks += 1

    tr = -(-rows // n_blocks)                        # ceil(rows / n_blocks)
    tr = ((tr + gran - 1) // gran) * gran            # round up to sublane gran
    tr = min(tr, max_tr)
    if tr >= rows:
        tr = rows                                    # tiny input: one full block
    return max(tr, min(gran, rows))


def mish(x):
    """Apply Mish elementwise to an array of any shape via a Pallas TPU kernel."""
    orig_shape = x.shape
    orig_dtype = x.dtype

    flat = x.reshape(-1)
    n = flat.shape[0]
    n_aligned = (n // _LANES) * _LANES

    if n_aligned == 0:
        # Fewer than 128 elements: no full lane row for the kernel.
        return _mish_jnp(flat).reshape(orig_shape)

    rows = n_aligned // _LANES
    x2d = flat[:n_aligned].reshape(rows, _LANES)

    tile_rows = _choose_tile_rows(rows, orig_dtype)
    grid = (pl.cdiv(rows, tile_rows),)

    out2d = pl.pallas_call(
        _mish_kernel,
        out_shape=jax.ShapeDtypeStruct((rows, _LANES), orig_dtype),
        grid=grid,
        in_specs=[pl.BlockSpec((tile_rows, _LANES), lambda i: (i, 0))],
        out_specs=pl.BlockSpec((tile_rows, _LANES), lambda i: (i, 0)),
        compiler_params=pltpu.CompilerParams(
            dimension_semantics=("parallel",),
            vmem_limit_bytes=48 << 20,
        ),
    )(x2d)

    out_flat = out2d.reshape(-1)
    if n_aligned != n:
        # <=127-element tail computed with plain jnp (no pad/unpad HBM passes).
        tail = _mish_jnp(flat[n_aligned:])
        out_flat = jnp.concatenate([out_flat, tail])
    return out_flat.reshape(orig_shape)


def _mish_ref(x):
    x32 = x.astype(jnp.float32)
    sp = jnp.log1p(jnp.exp(-jnp.abs(x32))) + jnp.maximum(x32, 0.0)
    return x32 * jnp.tanh(sp)


if __name__ == "__main__":
    key = jax.random.PRNGKey(0)

    # Main check: f32, NCHW (2, 4, 16, 16) — 128-aligned path, exact divide.
    x = jax.random.normal(key, (2, 4, 16, 16), dtype=jnp.float32) * 3.0
    y = jax.block_until_ready(mish(x))
    y_ref = _mish_ref(x)
    assert y.shape == x.shape and y.dtype == x.dtype
    assert jnp.allclose(y.astype(jnp.float32), y_ref, atol=1e-5, rtol=1e-5), (
        float(jnp.max(jnp.abs(y.astype(jnp.float32) - y_ref)))
    )

    # Unaligned size: exercises the aligned-prefix + jnp-tail path.
    xu = jax.random.normal(jax.random.PRNGKey(1), (3, 67), dtype=jnp.float32) * 3.0
    yu = jax.block_until_ready(mish(xu))
    assert jnp.allclose(yu, _mish_ref(xu), atol=1e-5, rtol=1e-5)

    # bf16 path: exercises dtype pass-through + approx-reciprocal branch.
    xb = (jax.random.normal(jax.random.PRNGKey(2), (2, 4, 16, 16)) * 3.0).astype(
        jnp.bfloat16
    )
    yb = jax.block_until_ready(mish(xb))
    assert yb.dtype == jnp.bfloat16
    assert jnp.allclose(
        yb.astype(jnp.float32), _mish_ref(xb), atol=5e-2, rtol=5e-2
    )

    print("KERNEL_OK")
</pallas_src>

<mosaic_0001>
module attributes {stable_mosaic.version = 11 : i64} {
  func.func @_mish_kernel(%arg0: i32, %arg1: memref<8x128xf32, #tpu.memory_space<vmem>>, %arg2: memref<8x128xf32, #tpu.memory_space<vmem>>) attributes {dimension_semantics = [#tpu.dimension_semantics<parallel>], iteration_bounds = array<i64: 2>, scalar_prefetch = 0 : i64, scratch_operands = 0 : i64, tpu.core_type = #tpu.core_type<tc>, window_params = [{transform_indices = @transform_0, window_bounds = array<i64: 8, 128>}, {transform_indices = @transform_1, window_bounds = array<i64: 8, 128>}]} {
    %c0 = arith.constant 0 : index
    %c0_0 = arith.constant 0 : index
    %0 = vector.load %arg1[%c0, %c0_0] : memref<8x128xf32, #tpu.memory_space<vmem>>, vector<8x128xf32>
    %1 = math.absf %0 : vector<8x128xf32>
    %cst = arith.constant 0.000000e+00 : f32
    %2 = vector.broadcast %cst : f32 to vector<8x128xf32>
    %3 = arith.subf %2, %1 : vector<8x128xf32>
    %4 = math.exp %3 : vector<8x128xf32>
    %cst_1 = arith.constant 1.000000e+00 : f32
    %5 = vector.broadcast %cst_1 : f32 to vector<8x128xf32>
    %6 = arith.addf %5, %4 : vector<8x128xf32>
    %cst_2 = arith.constant 1.000000e+00 : f32
    %7 = vector.broadcast %cst_2 : f32 to vector<8x128xf32>
    %8 = arith.addf %7, %4 : vector<8x128xf32>
    %9 = arith.mulf %6, %8 : vector<8x128xf32>
    %cst_3 = arith.constant 0.000000e+00 : f32
    %10 = vector.broadcast %cst_3 : f32 to vector<8x128xf32>
    %11 = arith.cmpf oge, %0, %10 : vector<8x128xf32>
    %12 = arith.mulf %4, %4 : vector<8x128xf32>
    %cst_4 = arith.constant 1.000000e+00 : f32
    %13 = vector.broadcast %cst_4 : f32 to vector<8x128xf32>
    %14 = arith.select %11, %12, %13 : vector<8x128xi1>, vector<8x128xf32>
    %15 = arith.subf %9, %14 : vector<8x128xf32>
    %16 = arith.addf %9, %14 : vector<8x128xf32>
    %17 = arith.mulf %0, %15 : vector<8x128xf32>
    %18 = arith.divf %17, %16 : vector<8x128xf32>
    %c0_5 = arith.constant 0 : index
    %c0_6 = arith.constant 0 : index
    %19 = vector.load %arg2[%c0_5, %c0_6] : memref<8x128xf32, #tpu.memory_space<vmem>>, vector<8x128xf32>
    tpu.vector_store %arg2[%c0_5, %c0_6], %18 {strides = array<i32>} : memref<8x128xf32, #tpu.memory_space<vmem>>, vector<8x128xf32>,
    return
  }
  func.func @transform_0(%arg0: i32) -> (i32, i32) {
    %c0_i32 = arith.constant 0 : i32
    %c0_i32_0 = arith.constant 0 : i32
    return %arg0, %c0_i32 : i32, i32
  }
  func.func @transform_1(%arg0: i32) -> (i32, i32) {
    %c0_i32 = arith.constant 0 : i32
    %c0_i32_0 = arith.constant 0 : i32
    return %arg0, %c0_i32 : i32, i32
  }
}

</mosaic_0001>

<bundles_post_ra>
// kernel: tpu_custom_call.1
= control target key start
LH: loop header
LB: loop body
LE: loop exit
PB: predicated region body
PF: predicated region fallthrough
CT: control target
= control target key end

     0   :  { %6 = vsyncpa [#allocation3], 0  ;;  %s541_s0 = inlined_call_operand.hbm [shape: f32[16,128], index: 0, kind: input, shape index: {}]   ;;  %s542_s1 = inlined_call_operand.hbm [shape: f32[16,128], index: 1, kind: output, shape index: {}]  }
   0x1   :  { %8 = vsyncpa [#allocation3 + $0x1], 0 }
   0x2   :  { %9 = vsyncpa [#allocation4], 0 }
   0x3   :  { %11 = vsyncpa [#allocation4 + $0x1], 0  ;;  %s400_s6 = smov 0   ;;  %s402_s7 = smov 0  }
   0x4   :  { %s404_s8 = smov 0   ;;  %s406_s9 = smov 0  }
   0x5 LB: > { %s421_s10 = sadd.s32 4294967295, %s386_s9   ;;  %s232_s11 = sadd.s32 4294967294, %s386_s9   ;;  %s386_s9 = sphi %s406_s9, %s559_s9   ;;  %s382_s8 = sphi %s404_s8, %s558_s8   ;;  %s378_s7 = sphi %s402_s7, %s557_s7   ;;  %s374_s6 = sphi %s400_s6, %s556_s6  }
   0x6   : > { %s425_s12 = sadd.s32 1, %s386_s9   ;;  %s24_s13 = sadd.s32 1, %s382_s8 }
   0x7   : > { %s21_s14 = ssub.s32 %s386_s9, %s425_s12  ;;  %p31_p0 = scmp.ne.s32.totalorder %s382_s8, %s378_s7 }
   0x8   : > { %p22_p1 = scmp.eq.s32.totalorder %s21_s14, 0  ;;  %p32_p2 = scmp.eq.s32.totalorder %s386_s9, 0 }
   0x9   : > { %p37_p3 = scmp.ne.s32.totalorder %s378_s7, %s374_s6  ;;  %p38_p4 = scmp.eq.s32.totalorder %s421_s10, 0 }
   0xa   : > { %s437_s15 = scalar_select %p22_p1, %s382_s8, %s24_s13  }
   0xb   : > { %p439_p5 = por %p32_p2, %p31_p0  ;;  %p443_p6 = por %p38_p4, %p37_p3 }
   0xc   : > { %p61_p7 = scmp.eq.s32.totalorder %s421_s10, 1  ;;  %p67_p8 = scmp.eq.s32.totalorder %s232_s11, 1 }
   0xd   : > { %s546_s17 = scalar_select %p443_p6, 1, 0 }
   0xe   : > { %p256_p10 = scmp.lt.s32.totalorder %s386_s9, 2  ;;  %p450_p11 = por %p61_p7, %p31_p0 }
   0xf   : > { %p454_p12 = por %p67_p8, %p37_p3  ;;  %s87_s20 = sand.u32 1, %s382_s8  }
  0x10   : > { %s547_s18 = scalar_select %p450_p11, 1, 0 }
  0x11   : > { %s548_s19 = scalar_select %p454_p12, 1, 0 }
  0x12   : > { %s236_s21 = sshll.u32 %s386_s9, 7  ;;  %s235_s22 = sshll.u32 %s87_s20, 3 }
  0x13   : > { %s463_s25 = scalar_lea.hbm %s541_s0, %s236_s21  ;;  %s91_s26 = scalar_lea.vmem [#allocation2], %s235_s22 }
  0x14   : > { %s98_s27 = sshll.u32 %s91_s26, 4  ;;  %p467_p13 = pnand %p256_p10, %p439_p5  ;;  %s471_s27 = int_to_ptr.vmem [resolvable:$true] %s98_s27 }
  0x15   : > { %s88_s29 = scalar_lea.sflag [#allocation3], %s87_s20  ;;  %s294_s30 = scalar_lea.hbm %s463_s25, 128 }
  0x16   : > { %p295_p2 = scmp.ne.s32.totalorder %s463_s25, %s294_s30  ;;  %p296_p3 = pneg %p467_p13 }
  0x17   : > { %s299_s4 = scalar_lea.hbm %s541_s0, 256  ;;  %p300_p5 = scmp.lt.s32.totalorder %s463_s25, %s541_s0 }
  0x18   : > { %p297_p4 = pnand %p296_p3, %p295_p2  ;;  %p301_p8 = scmp.lt.s32.totalorder %s299_s4, %s294_s30 }
  0x1a   : > { %p298_p7 = pneg %p297_p4  ;;  %p302_p10 = por %p301_p8, %p300_p5 }
  0x1c   : > { %p303_p9 = pnand %p302_p10, %p298_p7 }
  0x1e   : > { %306 = shalt.err (!%p303_p9)
}
  0x1f   : > { %s307_s13 = scalar_lea.vmem %s471_s27, 128  ;;  %s388_s14 = smov [#allocation2]  }
  0x20   : > { %p308_p0 = scmp.ne.s32.totalorder %s471_s27, %s307_s13  ;;  %s312_s16 = sshll.u32 %s388_s14, 4  ;;  %s313_s16 = int_to_ptr.vmem [resolvable:$false] %s312_s16 }
  0x21   : > { %s314_s20 = scalar_lea.vmem %s313_s16, 256  ;;  %p315_p4 = scmp.lt.s32.totalorder %s471_s27, %s313_s16 }
  0x22   : > { %p310_p1 = pnand %p308_p0, %p296_p3  ;;  %p316_p12 = scmp.lt.s32.totalorder %s314_s20, %s307_s13 }
  0x24   : > { %p311_p2 = pneg %p310_p1  ;;  %p317_p11 = por %p316_p12, %p315_p4 }
  0x26   : > { %p318_p6 = pnand %p317_p11, %p311_p2 }
  0x28   : > { %321 = shalt.err (!%p318_p6)
}
  0x29   : > { %251 = dma.hbm_to_vmem [thread:$0]  (!%p467_p13), %s463_s25, 128, %s471_s27, %s88_s29  }
  0x2a   : > { %p550_p9 = scmp.lt.s32.totalorder %s386_s9, 3  ;;  %p551_p7 = scmp.ge.s32.totalorder %s386_s9, 1 }
  0x2c   : > { %p104_p0 = pnand %p551_p7, %p550_p9 }
  0x2d   : > { %s498_s21 = sand.u32 (!%p104_p0), 1, %s378_s7   ;;  %p552_p6 = scmp.ne.s32.totalorder (!%p104_p0), %s546_s17, 0 }
  0x2e   : > { %107 = sbr.rel (%p104_p0) target bundleno = 108 (0x6c), region = 24  ;;  %s238_s22 = sshll.u32 (!%p104_p0), %s498_s21, 3 }
  0x2f   : > { %s110_s23 = scalar_lea.sflag (!%p104_p0), [#allocation3], %s498_s21  ;;  %s113_s24 = scalar_lea.vmem (!%p104_p0), [#allocation2], %s238_s22 }
  0x33   : > { %365 = dma.done.wait (%p552_p6), %s110_s23, 128  }
  0x34   : > { %367 = vsyncadd (%p552_p6), %s110_s23, 4294967168  ;;  %v132_v0 = vld [vmem:[%s113_s24] sm:$0xff]  ;;  %s131_s17 = scalar_lea.vmem [#allocation5], %s238_s22  ;;  %s241_s26 = sshll.u32 %s421_s10, 7 }
  0x35   : > { %v133_v1 = vand.u32 2147483647, %v132_v0  ;;  %vm139_vm0 = vcmp.ge.f32.partialorder %v132_v0, 0.0  ;;  %s162_s25 = sshll.u32 %s131_s17, 4  ;;  %s160_s29 = scalar_lea.hbm %s542_s1, %s241_s26  ;;  %s163_s25 = int_to_ptr.vmem [resolvable:$true] %s162_s25 }
  0x36   : > { %s149_s30 = scalar_lea.sflag [#allocation4], %s498_s21  ;;  %s322_s2 = scalar_lea.vmem %s163_s25, 128 }
  0x37   : > { %v134_v2 = vsub.f32 0.0, %v133_v1  ;;  %p323_p11 = scmp.ne.s32.totalorder %s163_s25, %s322_s2  ;;  %p553_p12 = scmp.ne.s32.totalorder %s547_s18, 0 }
  0x38   : > { %s389_s3 = smov [#allocation5]  }
  0x39   : > { %v135_v3 = vmul.f32 1.442695, %v134_v2  ;;  %p324_p13 = pnand %p323_p11, %p553_p12  ;;  %s326_s4 = sshll.u32 %s389_s3, 4  ;;  %s327_s4 = int_to_ptr.vmem [resolvable:$false] %s326_s4 }
  0x3a   : > { %s328_s5 = scalar_lea.vmem %s327_s4, 256  ;;  %p329_p3 = scmp.lt.s32.totalorder %s163_s25, %s327_s4 }
  0x3b   : > { %290 = vpow2.f32 %v135_v3  ;;  %p325_p1 = pneg %p324_p13  ;;  %p330_p5 = scmp.lt.s32.totalorder %s328_s5, %s322_s2 }
  0x3d   : > { %p331_p8 = por %p330_p5, %p329_p3 }
  0x3f   : > { %p332_p10 = pnand %p331_p8, %p325_p1 }
  0x48   : > { %v291_v4 = vpop.eup %290 }
  0x49   : > { %v137_v5 = vadd.f32 1.0, %v291_v4  ;;  %v140_v6 = vmul.f32 %v291_v4, %v291_v4 }
  0x4b   : > { %v138_v7 = vmul.f32 %v137_v5, %v137_v5  ;;  %v141_v8 = vsel %vm139_vm0, %v140_v6, 1.0 }
  0x4d   : > { %v143_v9 = vadd.f32 %v141_v8, %v138_v7  ;;  %v142_v10 = vsub.f32 %v138_v7, %v141_v8 }
  0x4f   : > { %292 = vrcp.f32 %v143_v9  ;;  %v144_v11 = vmul.f32 %v142_v10, %v132_v0 }
  0x5c   : > { %v293_v12 = vpop.eup %292 }
  0x5d   : > { %v146_v13 = vmul.f32 %v293_v12, %v144_v11 }
  0x5f   : > { %147 = vst [vmem:[%s131_s17] sm:$0xff] %v146_v13 }
  0x60   : > { %335 = shalt.err (!%p332_p10)
}
  0x61   : > { %s336_s10 = scalar_lea.hbm %s160_s29, 128  ;;  %s340_s14 = scalar_lea.hbm %s542_s1, 256 }
  0x62   : > { %p337_p2 = scmp.ne.s32.totalorder %s160_s29, %s336_s10  ;;  %p341_p7 = scmp.lt.s32.totalorder %s160_s29, %s542_s1 }
  0x63   : > { %p342_p0 = scmp.lt.s32.totalorder %s340_s14, %s336_s10 }
  0x64   : > { %p338_p4 = pnand %p337_p2, %p553_p12 }
  0x65   : > { %p343_p6 = por %p342_p0, %p341_p7 }
  0x66   : > { %p339_p9 = pneg %p338_p4 }
  0x68   : > { %p344_p11 = pnand %p343_p6, %p339_p9 }
  0x6a   : > { %347 = shalt.err (!%p344_p11)
}
  0x6b   : > { %246 = dma.vmem_to_hbm [thread:$0]  (%p553_p12), %s163_s25, 128, %s160_s29, %s149_s30  }
  0x6c PF: > { %s174_s21 = sand.u32 1, %s374_s6   ;;  %p554_p13 = scmp.ne.s32.totalorder %s548_s19, 0 }
  0x6d   : > { %p555_p1 = scmp.ge.s32.totalorder %s386_s9, 2  ;;  %s175_s22 = scalar_lea.sflag [#allocation4], %s174_s21 }
  0x6f   : > { %p253_p3 = pnand %p555_p1, %p554_p13 }
  0x71   : > { %p254_p5 = pneg %p253_p3 }
  0x73   : > { %369 = dma.done.wait (%p254_p5), %s175_s22, 128  }
  0x74   : > { %371 = vsyncadd (%p254_p5), %s175_s22, 4294967168  ;;  %p14_p8 = scmp.ge.s32.totalorder %s425_s12, 4   ;;  %s556_s6 = smov %s378_s7 }
  0x75   : > { %s557_s7 = smov %s382_s8  ;;  %s558_s8 = smov %s437_s15 }
  0x76   : > { %s559_s9 = smov %s425_s12  ;;  %16 = sbr.rel (!%p14_p8) target bundleno = 5 (0x5), region = 69 }
  0x7b   :  { %180 = vsyncpa [#allocation3], 1 }
  0x7c   :  { %182 = vsyncpa [#allocation3 + $0x1], 1 }
  0x7d   :  { %183 = vsyncpa [#allocation4], 1 }
  0x7e   :  { %185 = vsyncpa [#allocation4 + $0x1], 1 }

</bundles_post_ra>
